<compile_context>
chip_gen: v7x
topology: tpu7x:2x2x1
jax: 0.10.0
libtpu: 0.0.40
codegen_flags: <defaults>
</compile_context>

<pallas_src>
import functools

import jax
import jax.numpy as jnp
from jax import lax
from jax.experimental import pallas as pl
from jax.experimental.pallas import tpu as pltpu


def _se_kernel(x_ref, w1t_ref, b1_ref, w2t_ref, b2_ref, out_ref, acc_ref, *,
               inv_n, n_valid, rem, block_n):
    n = pl.program_id(1)
    n_last = pl.num_programs(1) - 1

    # ---- init accumulator at the first spatial tile of this batch element ----
    @pl.when(n == 0)
    def _():
        acc_ref[...] = jnp.zeros_like(acc_ref)

    # ---- squeeze: stream the tile in native dtype, upcast right after load ----
    x = x_ref[0].astype(jnp.float32)                       # (C, block_n)

    if rem:  # static: only emitted when N % block_n != 0 (masked tail tile)
        lane = lax.broadcasted_iota(jnp.int32, x.shape, 1)
        pos = n * block_n + lane                           # global spatial index
        x = jnp.where(pos < n_valid, x, 0.0)

    # Lane-group partial sums into a (C, 128) accumulator: pure VPU adds and one
    # full-width store per tile (no per-tile XLU reduce, no 1-lane masked RMW).
    k = block_n // 128
    s = x[:, 0:128]
    for j in range(1, k):
        s = s + x[:, j * 128:(j + 1) * 128]
    acc_ref[...] += s

    # ---- excite: tiny MLP + sigmoid, once per batch element, lane-dense ----
    @pl.when(n == n_last)
    def _():
        # Single cross-lane reduce per batch element, fused with the 1/N scale:
        # (1,128) . (C,128)^T  ->  (1, C) row of channel means.
        scale_row = jnp.full((1, 128), inv_n, dtype=jnp.float32)
        mean_row = lax.dot_general(
            scale_row, acc_ref[...],
            dimension_numbers=(((1,), (1,)), ((), ())),
            preferred_element_type=jnp.float32)            # (1, C)
        h = jnp.dot(mean_row, w1t_ref[...],
                    preferred_element_type=jnp.float32) + b1_ref[...]
        h = jnp.maximum(h, 0.0)                            # (1, mid)
        z = jnp.dot(h, w2t_ref[...],
                    preferred_element_type=jnp.float32) + b2_ref[...]
        gate = 1.0 / (1.0 + jnp.exp(-z))                   # sigmoid, (1, out_dim)
        out_ref[0] = gate.astype(out_ref.dtype)            # lane-dense row store


def se_forward(x_nchw, w1, b1, w2, b2, *, block_n=None, tile_budget_bytes=4 << 20):
    """SE_Module forward.

    x_nchw: (B, C, H, W), any float dtype (streamed natively, accumulated in f32)
    w1: (mid, C), b1: (mid,)            -- first 1x1 conv  (mid = C // 16)
    w2: (out_dim, mid), b2: (out_dim,)  -- second 1x1 conv
    Returns the gate, shape (B, out_dim, 1, 1) float32.
    """
    B, C, H, W = x_nchw.shape
    mid = w1.shape[0]
    out_dim = w2.shape[0]
    assert w1.shape == (mid, C) and w2.shape == (out_dim, mid)
    assert b1.shape == (mid,) and b2.shape == (out_dim,)

    N = H * W
    x_bcn = x_nchw.reshape(B, C, N)                 # free reshape, NATIVE dtype
    itemsize = jnp.dtype(x_bcn.dtype).itemsize

    if N < 128:
        # Tiny spatial map: zero-pad to one lane group (zeros don't change sums).
        x_bcn = jnp.pad(x_bcn, ((0, 0), (0, 0), (0, 128 - N)))
        n_len = 128
    else:
        n_len = N

    # ---- auto tile size: lane-aligned, sized from C / dtype / tile budget ----
    if block_n is None:
        bn = (tile_budget_bytes // max(1, C * itemsize)) // 128 * 128
        bn = max(128, min(bn, 32768))                # bound unrolled add count
        block_n = min(bn, (n_len // 128) * 128)      # never exceed the array extent
    assert block_n % 128 == 0 and 128 <= block_n <= n_len
    n_tiles = -(-n_len // block_n)                   # ceil; last tile may be partial
    rem = 0 if N < 128 else (N % block_n)            # 0 => no tail masking needed

    # Weights pre-transposed so the epilogue MLP is lane-dense (no in-kernel .T).
    w1t = w1.T.astype(jnp.float32)                   # (C, mid)
    w2t = w2.T.astype(jnp.float32)                   # (mid, out_dim)
    b1r = b1.reshape(1, mid).astype(jnp.float32)
    b2r = b2.reshape(1, out_dim).astype(jnp.float32)

    kernel = functools.partial(_se_kernel, inv_n=1.0 / float(N), n_valid=N,
                               rem=rem, block_n=block_n)

    # Explicit scoped-VMEM limit (x double-buffered + weights + accumulator).
    vmem_est = (2 * C * block_n * itemsize
                + 2 * 4 * (C * mid + mid + mid * out_dim + out_dim)
                + C * 128 * 4 + 2 * out_dim * 4)
    vmem_limit = int(min(64 << 20, max(32 << 20, 2 * vmem_est)))

    out = pl.pallas_call(
        kernel,
        out_shape=jax.ShapeDtypeStruct((B, 1, out_dim), jnp.float32),
        grid_spec=pltpu.PrefetchScalarGridSpec(
            num_scalar_prefetch=0,
            grid=(B, n_tiles),                                       # reduction last
            in_specs=[
                pl.BlockSpec((1, C, block_n), lambda b, n: (b, 0, n)),   # x (streamed)
                pl.BlockSpec((C, mid), lambda b, n: (0, 0)),             # W1^T
                pl.BlockSpec((1, mid), lambda b, n: (0, 0)),             # b1
                pl.BlockSpec((mid, out_dim), lambda b, n: (0, 0)),       # W2^T
                pl.BlockSpec((1, out_dim), lambda b, n: (0, 0)),         # b2
            ],
            out_specs=pl.BlockSpec((1, 1, out_dim), lambda b, n: (b, 0, 0)),
            scratch_shapes=[pltpu.VMEM((C, 128), jnp.float32)],          # channel sums
        ),
        compiler_params=pltpu.CompilerParams(
            dimension_semantics=("parallel", "arbitrary"),
            vmem_limit_bytes=vmem_limit),
    )(x_bcn, w1t, b1r, w2t, b2r)

    return out.reshape(B, out_dim, 1, 1)


def se_reference(x, w1, b1, w2, b2):
    """Pure-JAX reference mirroring the PyTorch SE_Module forward."""
    xf = x.astype(jnp.float32)
    mean = jnp.mean(xf, axis=(2, 3))                                # (B, C)
    h = jnp.maximum(mean @ w1.T + b1[None, :], 0.0)                 # (B, mid)
    z = h @ w2.T + b2[None, :]                                      # (B, out_dim)
    gate = jax.nn.sigmoid(z)
    return gate.reshape(x.shape[0], -1, 1, 1)


if __name__ == "__main__":
    key = jax.random.PRNGKey(0)
    # SE_Module needs in_dim // 16 >= 1, so in_dim must be >= 16.
    B, C, H, W = 2, 32, 16, 16
    out_dim = 32
    mid = C // 16                                                   # = 2

    ks = jax.random.split(key, 6)
    x = jax.random.normal(ks[0], (B, C, H, W), dtype=jnp.float32)
    w1 = 0.5 * jax.random.normal(ks[1], (mid, C), dtype=jnp.float32)
    b1 = 0.1 * jax.random.normal(ks[2], (mid,), dtype=jnp.float32)
    w2 = 0.5 * jax.random.normal(ks[3], (out_dim, mid), dtype=jnp.float32)
    b2 = 0.1 * jax.random.normal(ks[4], (out_dim,), dtype=jnp.float32)

    ref = se_reference(x, w1, b1, w2, b2)

    # 1) multi-tile spatial reduction (block_n=128 -> 2 spatial tiles per batch).
    out_tiled = jax.block_until_ready(se_forward(x, w1, b1, w2, b2, block_n=128))
    assert out_tiled.shape == (B, out_dim, 1, 1)
    assert jnp.allclose(out_tiled, ref, atol=1e-5, rtol=1e-5), (
        float(jnp.max(jnp.abs(out_tiled - ref))))

    # 2) auto-sized tile (single 256-lane tile here).
    out_auto = jax.block_until_ready(se_forward(x, w1, b1, w2, b2))
    assert jnp.allclose(out_auto, ref, atol=1e-5, rtol=1e-5), (
        float(jnp.max(jnp.abs(out_auto - ref))))

    # 3) native-dtype (bf16) streaming + non-divisible N (14*14=196 -> masked tail).
    x_bf = jax.random.normal(ks[5], (B, C, 14, 14), dtype=jnp.float32).astype(jnp.bfloat16)
    ref_bf = se_reference(x_bf, w1, b1, w2, b2)
    out_bf = jax.block_until_ready(se_forward(x_bf, w1, b1, w2, b2))
    assert out_bf.shape == (B, out_dim, 1, 1)
    assert jnp.allclose(out_bf, ref_bf, atol=1e-4, rtol=1e-4), (
        float(jnp.max(jnp.abs(out_bf - ref_bf))))

    print("KERNEL_OK")
</pallas_src>

<mosaic_0001>
module attributes {stable_mosaic.version = 11 : i64} {
  func.func @_se_kernel(%arg0: i32, %arg1: i32, %arg2: memref<1x32x128xf32, #tpu.memory_space<vmem>>, %arg3: memref<32x2xf32, #tpu.memory_space<vmem>>, %arg4: memref<1x2xf32, #tpu.memory_space<vmem>>, %arg5: memref<2x32xf32, #tpu.memory_space<vmem>>, %arg6: memref<1x32xf32, #tpu.memory_space<vmem>>, %arg7: memref<1x1x32xf32, #tpu.memory_space<vmem>>, %arg8: memref<32x128xf32, #tpu.memory_space<vmem>>) attributes {dimension_semantics = [#tpu.dimension_semantics<parallel>, #tpu.dimension_semantics<arbitrary>], iteration_bounds = array<i64: 2, 2>, scalar_prefetch = 0 : i64, scratch_operands = 1 : i64, tpu.core_type = #tpu.core_type<tc>, window_params = [{transform_indices = @transform_0, window_bounds = array<i64: 1, 32, 128>}, {pipeline_mode = #tpu.pipeline_mode<synchronous>, transform_indices = @transform_1, window_bounds = array<i64: 32, 2>}, {pipeline_mode = #tpu.pipeline_mode<synchronous>, transform_indices = @transform_2, window_bounds = array<i64: 1, 2>}, {pipeline_mode = #tpu.pipeline_mode<synchronous>, transform_indices = @transform_3, window_bounds = array<i64: 2, 32>}, {pipeline_mode = #tpu.pipeline_mode<synchronous>, transform_indices = @transform_4, window_bounds = array<i64: 1, 32>}, {transform_indices = @transform_5, window_bounds = array<i64: 1, 1, 32>}]} {
    %c0_i32 = arith.constant 0 : i32
    %0 = arith.cmpi eq, %arg1, %c0_i32 : i32
    %1 = arith.extui %0 : i1 to i32
    %c0_i32_0 = arith.constant 0 : i32
    %2 = arith.cmpi ne, %1, %c0_i32_0 : i32
    scf.if %2 {
      %cst = arith.constant 0.000000e+00 : f32
      %11 = vector.broadcast %cst : f32 to vector<32x128xf32>
      %c0_8 = arith.constant 0 : index
      %c0_9 = arith.constant 0 : index
      %12 = vector.load %arg8[%c0_8, %c0_9] : memref<32x128xf32, #tpu.memory_space<vmem>>, vector<32x128xf32>
      tpu.vector_store %arg8[%c0_8, %c0_9], %11 {strides = array<i32>} : memref<32x128xf32, #tpu.memory_space<vmem>>, vector<32x128xf32>,
    } else {
    }
    %c0 = arith.constant 0 : index
    %c0_1 = arith.constant 0 : index
    %c0_2 = arith.constant 0 : index
    %3 = vector.load %arg2[%c0, %c0_1, %c0_2] : memref<1x32x128xf32, #tpu.memory_space<vmem>>, vector<1x32x128xf32>
    %4 = vector.shape_cast %3 : vector<1x32x128xf32> to vector<32x128xf32>
    %c0_3 = arith.constant 0 : index
    %c0_4 = arith.constant 0 : index
    %5 = vector.load %arg8[%c0_3, %c0_4] : memref<32x128xf32, #tpu.memory_space<vmem>>, vector<32x128xf32>
    %6 = arith.addf %5, %4 : vector<32x128xf32>
    %c0_5 = arith.constant 0 : index
    %c0_6 = arith.constant 0 : index
    %7 = vector.load %arg8[%c0_5, %c0_6] : memref<32x128xf32, #tpu.memory_space<vmem>>, vector<32x128xf32>
    tpu.vector_store %arg8[%c0_5, %c0_6], %6 {strides = array<i32>} : memref<32x128xf32, #tpu.memory_space<vmem>>, vector<32x128xf32>,
    %c1_i32 = arith.constant 1 : i32
    %8 = arith.cmpi eq, %arg1, %c1_i32 : i32
    %9 = arith.extui %8 : i1 to i32
    %c0_i32_7 = arith.constant 0 : i32
    %10 = arith.cmpi ne, %9, %c0_i32_7 : i32
    scf.if %10 {
      %cst = arith.constant 3.906250e-03 : f32
      %11 = vector.broadcast %cst : f32 to vector<1x128xf32>
      %c0_8 = arith.constant 0 : index
      %c0_9 = arith.constant 0 : index
      %12 = vector.load %arg8[%c0_8, %c0_9] : memref<32x128xf32, #tpu.memory_space<vmem>>, vector<32x128xf32>
      %cst_10 = arith.constant dense<0.000000e+00> : vector<1x32xf32>
      %13 = tpu.matmul %11, %12, %cst_10 {dimension_numbers = #tpu.dot_dimension_numbers<[1], [1], [0], [0], [0, 0, 1, 0], [], []>} : vector<1x128xf32>, vector<32x128xf32>, vector<1x32xf32> -> vector<1x32xf32>
      %c0_11 = arith.constant 0 : index
      %c0_12 = arith.constant 0 : index
      %14 = vector.load %arg3[%c0_11, %c0_12] : memref<32x2xf32, #tpu.memory_space<vmem>>, vector<32x2xf32>
      %cst_13 = arith.constant dense<0.000000e+00> : vector<1x2xf32>
      %15 = tpu.matmul %13, %14, %cst_13 {dimension_numbers = #tpu.dot_dimension_numbers<[1], [0], [0], [1], [0, 0, 1, 1], [], []>} : vector<1x32xf32>, vector<32x2xf32>, vector<1x2xf32> -> vector<1x2xf32>
      %c0_14 = arith.constant 0 : index
      %c0_15 = arith.constant 0 : index
      %16 = vector.load %arg4[%c0_14, %c0_15] : memref<1x2xf32, #tpu.memory_space<vmem>>, vector<1x2xf32>
      %17 = arith.addf %15, %16 : vector<1x2xf32>
      %cst_16 = arith.constant 0.000000e+00 : f32
      %18 = vector.broadcast %cst_16 : f32 to vector<1x2xf32>
      %19 = arith.maximumf %17, %18 : vector<1x2xf32>
      %c0_17 = arith.constant 0 : index
      %c0_18 = arith.constant 0 : index
      %20 = vector.load %arg5[%c0_17, %c0_18] : memref<2x32xf32, #tpu.memory_space<vmem>>, vector<2x32xf32>
      %cst_19 = arith.constant dense<0.000000e+00> : vector<1x32xf32>
      %21 = tpu.matmul %19, %20, %cst_19 {dimension_numbers = #tpu.dot_dimension_numbers<[1], [0], [0], [1], [0, 0, 1, 1], [], []>} : vector<1x2xf32>, vector<2x32xf32>, vector<1x32xf32> -> vector<1x32xf32>
      %c0_20 = arith.constant 0 : index
      %c0_21 = arith.constant 0 : index
      %22 = vector.load %arg6[%c0_20, %c0_21] : memref<1x32xf32, #tpu.memory_space<vmem>>, vector<1x32xf32>
      %23 = arith.addf %21, %22 : vector<1x32xf32>
      %cst_22 = arith.constant 0.000000e+00 : f32
      %24 = vector.broadcast %cst_22 : f32 to vector<1x32xf32>
      %25 = arith.subf %24, %23 : vector<1x32xf32>
      %26 = math.exp %25 : vector<1x32xf32>
      %cst_23 = arith.constant 1.000000e+00 : f32
      %27 = vector.broadcast %cst_23 : f32 to vector<1x32xf32>
      %28 = arith.addf %27, %26 : vector<1x32xf32>
      %cst_24 = arith.constant 1.000000e+00 : f32
      %29 = vector.broadcast %cst_24 : f32 to vector<1x32xf32>
      %30 = arith.divf %29, %28 : vector<1x32xf32>
      %c0_25 = arith.constant 0 : index
      %c0_26 = arith.constant 0 : index
      %c0_27 = arith.constant 0 : index
      %31 = vector.load %arg7[%c0_25, %c0_26, %c0_27] : memref<1x1x32xf32, #tpu.memory_space<vmem>>, vector<1x1x32xf32>
      %32 = vector.shape_cast %31 : vector<1x1x32xf32> to vector<1x32xf32>
      %33 = vector.shape_cast %30 : vector<1x32xf32> to vector<1x1x32xf32>
      tpu.vector_store %arg7[%c0_25, %c0_26, %c0_27], %33 {strides = array<i32>} : memref<1x1x32xf32, #tpu.memory_space<vmem>>, vector<1x1x32xf32>,
    } else {
    }
    return
  }
  func.func @transform_0(%arg0: i32, %arg1: i32) -> (i32, i32, i32) {
    %c0_i32 = arith.constant 0 : i32
    %c0_i32_0 = arith.constant 0 : i32
    return %arg0, %c0_i32, %arg1 : i32, i32, i32
  }
  func.func @transform_1(%arg0: i32, %arg1: i32) -> (i32, i32) {
    %c0_i32 = arith.constant 0 : i32
    %c0_i32_0 = arith.constant 0 : i32
    %c0_i32_1 = arith.constant 0 : i32
    return %c0_i32, %c0_i32_0 : i32, i32
  }
  func.func @transform_2(%arg0: i32, %arg1: i32) -> (i32, i32) {
    %c0_i32 = arith.constant 0 : i32
    %c0_i32_0 = arith.constant 0 : i32
    %c0_i32_1 = arith.constant 0 : i32
    return %c0_i32, %c0_i32_0 : i32, i32
  }
  func.func @transform_3(%arg0: i32, %arg1: i32) -> (i32, i32) {
    %c0_i32 = arith.constant 0 : i32
    %c0_i32_0 = arith.constant 0 : i32
    %c0_i32_1 = arith.constant 0 : i32
    return %c0_i32, %c0_i32_0 : i32, i32
  }
  func.func @transform_4(%arg0: i32, %arg1: i32) -> (i32, i32) {
    %c0_i32 = arith.constant 0 : i32
    %c0_i32_0 = arith.constant 0 : i32
    %c0_i32_1 = arith.constant 0 : i32
    return %c0_i32, %c0_i32_0 : i32, i32
  }
  func.func @transform_5(%arg0: i32, %arg1: i32) -> (i32, i32, i32) {
    %c0_i32 = arith.constant 0 : i32
    %c0_i32_0 = arith.constant 0 : i32
    %c0_i32_1 = arith.constant 0 : i32
    return %arg0, %c0_i32, %c0_i32_0 : i32, i32, i32
  }
}

</mosaic_0001>

<bundles_post_ra>
// kernel: tpu_custom_call.1
= control target key start
LH: loop header
LB: loop body
LE: loop exit
PB: predicated region body
PF: predicated region fallthrough
CT: control target
= control target key end

     0   :  { %s1240_s0 = inlined_call_operand.hbm [shape: f32[2,32,256], index: 0, kind: input, shape index: {}]   ;;  %s1241_s1 = inlined_call_operand.vmem [shape: f32[32,2], index: 1, kind: input, shape index: {}]   ;;  %s1242_s2 = inlined_call_operand.vmem [shape: f32[1,2], index: 2, kind: input, shape index: {}]   ;;  %s1243_s3 = inlined_call_operand.vmem [shape: f32[2,32], index: 3, kind: input, shape index: {}]   ;;  %s1244_s4 = inlined_call_operand.vmem [shape: f32[1,32], index: 4, kind: input, shape index: {}]   ;;  %s1245_s5 = inlined_call_operand.hbm [shape: f32[2,1,32], index: 5, kind: output, shape index: {}]  }
   0x1   :  { %1250 = sst [smem:[#allocation12_spill]] %s1245_s5 }
   0x2   :  { %10 = vsyncpa [#allocation4], 0 }
   0x3   :  { %12 = vsyncpa [#allocation4 + $0x1], 0 }
   0x4   :  { %13 = vsyncpa [#allocation5], 0 }
   0x5   :  { %15 = vsyncpa [#allocation5 + $0x1], 0  ;;  %s995_s18 = smov 0   ;;  %s997_s19 = smov 0  }
   0x6   :  { %s999_s20 = smov 0   ;;  %s1001_s21 = smov 0  }
   0x7   :  { %s1003_s22 = smov 0   ;;  %s1005_s23 = smov 0  }
   0x8   :  { %s1007_s24 = smov 0   ;;  %s1009_s25 = smov 0  }
   0x9   :  { %s1011_s26 = smov 0   ;;  %s1013_s27 = smov 0  }
   0xa   :  { %s1015_s28 = smov 0  }
   0xb LB: > { %s619_s29 = sadd.s32 4294967295, %s953_s28   ;;  %s620_s30 = sadd.s32 4294967294, %s953_s28   ;;  %s953_s28 = sphi %s1015_s28, %s21_s28   ;;  %s949_s27 = sphi %s1013_s27, %s1274_s27   ;;  %s945_s26 = sphi %s1011_s26, %s1273_s26   ;;  %s941_s25 = sphi %s1009_s25, %s1272_s25   ;;  %s937_s24 = sphi %s1007_s24, %s1271_s24   ;;  %s933_s23 = sphi %s1005_s23, %s1270_s23   ;;  %s929_s22 = sphi %s1003_s22, %s1269_s22   ;;  %s925_s21 = sphi %s1001_s21, %s1268_s21   ;;  %s921_s20 = sphi %s999_s20, %s1267_s20   ;;  %s917_s19 = sphi %s997_s19, %s1266_s19   ;;  %s913_s18 = sphi %s995_s18, %s1265_s18  }
   0xc   : > { %s30_s6 = sadd.s32 1, %s945_s26  ;;  %s33_s7 = sadd.s32 1, %s949_s27 }
   0xd   : > { %p31_p0 = scmp.ge.s32.totalorder %s30_s6, 2  ;;  %s42_s8 = sadd.s32 1, %s933_s23 }
   0xe   : > { %p49_p1 = scmp.ne.s32.totalorder %s933_s23, %s929_s22  ;;  %p50_p2 = scmp.eq.s32.totalorder %s953_s28, 0 }
   0xf   : > { %s1276_s6 = smov (%p31_p0, %s30_s6), 0  ;;  %s1278_s7 = smov (!%p31_p0, %s33_s7), %s949_s27 }
  0x10   : > { %1251 = sst [smem:[#allocation9_spill]] %s1276_s6  ;;  %s38_s9 = ssub.s32 %s945_s26, %s1276_s6 }
  0x11   : > { %p1061_p3 = por %p50_p2, %p49_p1  ;;  %p35_p4 = scmp.ge.s32.totalorder %s1278_s7, 2 }
  0x12   : > { %p55_p5 = scmp.ne.s32.totalorder %s929_s22, %s925_s21  ;;  %p56_p6 = scmp.eq.s32.totalorder %s619_s29, 0 }
  0x13   : > { %s152_s11 = sadd.s32 1, %s921_s20  ;;  %s1280_s7 = smov (%p35_p4, %s1278_s7), 0 }
  0x14   : > { %1253 = sst [smem:[#allocation10_spill]] %s1280_s7  ;;  %p1069_p7 = por %p56_p6, %p55_p5 }
  0x15   : > { %p162_p8 = scmp.ne.s32.totalorder %s921_s20, %s917_s19  ;;  %s37_s13 = ssub.s32 %s949_s27, %s1280_s7 }
  0x16   : > { %p163_p9 = scmp.eq.s32.totalorder %s619_s29, 3  ;;  %s39_s14 = sor.u32 %s38_s9, %s37_s13 }
  0x17   : > { %p150_p10 = scmp.eq.s32.totalorder %s37_s13, 0  ;;  %p40_p11 = scmp.eq.s32.totalorder %s39_s14, 0 }
  0x18   : > { %p1077_p12 = por %p163_p9, %p162_p8  ;;  %p168_p13 = scmp.ne.s32.totalorder %s917_s19, %s913_s18 }
  0x19   : > { %s1082_s16 = scalar_select %p150_p10, %s921_s20, %s152_s11  }
  0x1a   : > { %s1255_s15 = scalar_select %p1077_p12, 1, 0 }
  0x1b   : > { %1256 = sst [smem:[#allocation11_spill]] %s1082_s16  ;;  %p169_p0 = scmp.eq.s32.totalorder %s620_s30, 3 }
  0x1c   : > { %s1085_s17 = scalar_select %p40_p11, %s933_s23, %s42_s8  }
  0x1d   : > { %p699_p1 = scmp.lt.s32.totalorder %s953_s28, 4  ;;  %p1090_p2 = por %p169_p0, %p168_p13 }
  0x1e   : > { %s201_s29 = sand.u32 1, %s933_s23   ;;  %s624_s13 = sshll.u32 %s949_s27, 3 }
  0x1f   : > { %s1257_s21 = scalar_select %p1090_p2, 1, 0 }
  0x20   : > { %s623_s9 = sshll.u32 %s201_s29, 5  ;;  %s210_s14 = sadd.s32 %s945_s26, %s624_s13 }
  0x21   : > { %s205_s7 = scalar_lea.vmem [#allocation3], %s623_s9  ;;  %s625_s5 = sshll.u32 %s210_s14, 7 }
  0x22   : > { %s213_s6 = sshll.u32 %s205_s7, 4  ;;  %s1102_s8 = scalar_lea.hbm %s1240_s0, %s625_s5  ;;  %s1097_s6 = int_to_ptr.vmem [resolvable:$true] %s213_s6 }
  0x23   : > { %p1106_p4 = pnand %p699_p1, %p1061_p3  ;;  %s1110_s7 = scalar_lea.sflag [#allocation4], %s201_s29 }
  0x24   : > { %s801_s9 = scalar_lea.hbm %s1102_s8, 512  ;;  %s806_s16 = scalar_lea.hbm %s1240_s0, 2048 }
  0x25   : > { %p802_p5 = scmp.ne.s32.totalorder %s1102_s8, %s801_s9  ;;  %p803_p6 = pneg %p1106_p4 }
  0x26   : > { %p807_p3 = scmp.lt.u32.totalorder %s1102_s8, %s1240_s0  ;;  %p808_p10 = scmp.lt.u32.totalorder %s806_s16, %s801_s9 }
  0x27   : > { %p804_p8 = pnand %p803_p6, %p802_p5  ;;  %p810_p13 = scmp.lt.u32.totalorder %s801_s9, %s1102_s8 }
  0x28   : > { %p809_p11 = por %p808_p10, %p807_p3 }
  0x29   : > { %p805_p9 = pneg %p804_p8 }
  0x2a   : > { %p811_p0 = por %p810_p13, %p809_p11 }
  0x2c   : > { %p812_p1 = pnand %p811_p0, %p805_p9 }
  0x2e   : > { %815 = shalt.err (!%p812_p1)
}
  0x2f   : > { %s816_s29 = scalar_lea.vmem %s1097_s6, 512  ;;  %s955_s11 = smov [#allocation3]  }
  0x30   : > { %p817_p5 = scmp.ne.s32.totalorder %s1097_s6, %s816_s29  ;;  %s821_s5 = sshll.u32 %s955_s11, 4  ;;  %s822_s5 = int_to_ptr.vmem [resolvable:$false] %s821_s5 }
  0x31   : > { %s823_s10 = scalar_lea.vmem %s822_s5, 1024  ;;  %p824_p12 = scmp.lt.s32.totalorder %s1097_s6, %s822_s5 }
  0x32   : > { %p819_p8 = pnand %p817_p5, %p803_p6  ;;  %p825_p3 = scmp.lt.s32.totalorder %s823_s10, %s816_s29 }
  0x34   : > { %p820_p2 = pneg %p819_p8  ;;  %p826_p10 = por %p825_p3, %p824_p12 }
  0x36   : > { %p827_p11 = pnand %p826_p10, %p820_p2 }
  0x38   : > { %830 = shalt.err (!%p827_p11)
}
  0x39   : > { %s956_s9 = smov 256   ;;  %s957_s16 = smov 128  }
  0x3a   : > { %s958_s13 = smov 8   ;;  %p626_p6 = scmp.ge.s32.totalorder %s953_s28, 1 }
  0x3b   : > { %694 = dma.hbm_to_vmem [thread:$0]  (!%p1106_p4), %s1102_s8, 512, %s1097_s6, %s1110_s7, %s956_s9, %s957_s16, %s958_s13  }
  0x3c   : > { %p221_p9 = scmp.lt.s32.totalorder %s953_s28, 5 }
  0x3e   : > { %p222_p13 = pnand %p626_p6, %p221_p9 }
  0x3f   : > { %s227_s14 = sand.u32 (!%p222_p13), 1, %s929_s22  }
  0x40   : > { %225 = sbr.rel (%p222_p13) target bundleno = 807 (0x327), region = 40  ;;  %s627_s29 = sshll.u32 (!%p222_p13), %s227_s14, 5 }
  0x41   : > { %s228_s11 = scalar_lea.sflag (!%p222_p13), [#allocation4], %s227_s14  ;;  %s231_s5 = scalar_lea.vmem (!%p222_p13), [#allocation3], %s627_s29 }
  0x47   : > { %904 = dma.done.wait (%p1069_p7), %s228_s11, 512  }
  0x48   : > { %906 = vsyncadd (%p1069_p7), %s228_s11, 4294966784  ;;  %s255_s10 = sand.u32 1, %s917_s19   ;;  %p628_p12 = scmp.ne.s32.totalorder %s937_s24, 0 }
  0x49   : > { %s1148_s6 = scalar_lea.vmem [#allocation6], %s255_s10  ;;  %v959_v0 = vmov (!%p628_p12), 0.0  }
  0x4a   : > { %260 = sbr.rel (%p628_p12) target bundleno = 81 (0x51), region = 48  ;;  %261 = vst [vmem:[#allocation2] sm:$0xff] (!%p628_p12), %v959_v0  ;;  %262 = vst [vmem:[#allocation2 + $0x8] sm:$0xff] (!%p628_p12), %v959_v0 }
  0x4b   : > { %263 = vst [vmem:[#allocation2 + $0x10] sm:$0xff] (!%p628_p12), %v959_v0  ;;  %264 = vst [vmem:[#allocation2 + $0x18] sm:$0xff] (!%p628_p12), %v959_v0 }
  0x51 PF: > { %v265_v1 = vld [vmem:[%s231_s5] sm:$0xff]  ;;  %v266_v3 = vld [vmem:[%s231_s5 + $0x8] sm:$0xff]  ;;  %v267_v6 = vld [vmem:[%s231_s5 + $0x10] sm:$0xff]  ;;  %p629_p7 = scmp.ne.s32.totalorder %s937_s24, 1 }
  0x52   : > { %v269_v2 = vld [vmem:[#allocation2] sm:$0xff]  ;;  %v270_v5 = vld [vmem:[#allocation2 + $0x8] sm:$0xff]  ;;  %v271_v7 = vld [vmem:[#allocation2 + $0x10] sm:$0xff]  ;;  %v960_v15 = vmov (!%p629_p7), 0.0|0.0   ;;  %vm961_vm0 = vmmov (!%p629_p7), 0   ;;  %v962_v17 = vmov (!%p629_p7), 0.0  }
  0x53   : > { %v273_v4 = vadd.f32 %v269_v2, %v265_v1  ;;  %v274_v8 = vadd.f32 %v270_v5, %v266_v3  ;;  %v275_v9 = vadd.f32 %v271_v7, %v267_v6  ;;  %v268_v10 = vld [vmem:[%s231_s5 + $0x18] sm:$0xff]  ;;  %284 = sbr.rel (%p629_p7) target bundleno = 781 (0x30d), region = 52  ;;  %675 = vmatprep.subr.bf16.mxu0 (!%p629_p7), %v960_v15  ;;  %656 = vmatprep.mubr.msk.f32.mxu0 (!%p629_p7), %vm961_vm0, %v962_v17  ;;  %v359_v18 = vld [vmem:[%s1241_s1] sm:$0xff] (!%p629_p7)  ;;  %v360_v19 = vld [vmem:[%s1241_s1 + $0x8] sm:$0xff] (!%p629_p7)  ;;  %v963_v27 = vmov (!%p629_p7), 0.00390625  }
  0x54   : > { %v272_v11 = vld [vmem:[#allocation2 + $0x18] sm:$0xff]  ;;  %681 = vmatprep.subr.bf16.mxu1 (!%p629_p7), %v960_v15  ;;  %v682_v20 = vpack.c.bf16 (!%p629_p7), %v360_v19, %v359_v18  ;;  %v361_v21 = vld [vmem:[%s1241_s1 + $0x10] sm:$0xff] (!%p629_p7)  ;;  %667 = vmatprep.mubr.msk.f32.mxu1 (!%p629_p7), %vm961_vm0, %v962_v17  ;;  %vm364_vm1 = vcmask (!%p629_p7), 261120   ;;  %v439_v30 = vld [vmem:[%s1243_s3] sm:$0x3] (!%p629_p7)  ;;  %vm445_vm2 = vcmask (!%p629_p7), 1041408  }
  0x55   : > { %277 = vst [vmem:[#allocation2] sm:$0xff] %v273_v4  ;;  %v276_v12 = vadd.f32 %v272_v11, %v268_v10  ;;  %278 = vst [vmem:[#allocation2 + $0x8] sm:$0xff] %v274_v8  ;;  %v362_v22 = vld [vmem:[%s1241_s1 + $0x18] sm:$0xff] (!%p629_p7)  ;;  %v363_v31 = vld [vmem:[%s1242_s2] sm:$0x1] (!%p629_p7)  ;;  %vm441_vm3 = vcmask (!%p629_p7), 15360  }
  0x56   : > { %279 = vst [vmem:[#allocation2 + $0x10] sm:$0xff] %v275_v9  ;;  %683 = vmatpush3.bf16.msra.mxu1 (!%p629_p7), %v682_v20  ;;  %v685_v25 = vpack.c.bf16 (!%p629_p7), %v362_v22, %v361_v21  ;;  %v440_v36 = vld [vmem:[%s1244_s4] sm:$0x1] (!%p629_p7)  ;;  %vm525_vm4 = vcmask (!%p629_p7), 253952  }
  0x57   : > { %280 = vst [vmem:[#allocation2 + $0x18] sm:$0xff] %v276_v12  ;;  %684 = vmatprep.subr.bf16.mxu1 (!%p629_p7), %v960_v15 }
  0x5a   : > { %686 = vmatpush3.bf16.msra.mxu1 %v685_v25 }
  0x5b   : > { %670 = vmatprep.subr.mxu1 %v962_v17 }
  0x5c   : > { %v285_v13 = vld [vmem:[#allocation2] sm:$0xff]  ;;  %v286_v14 = vld [vmem:[#allocation2 + $0x8] sm:$0xff] }
  0x5d   : > { %v676_v16 = vpack.c.bf16 %v286_v14, %v285_v13  ;;  %v287_v23 = vld [vmem:[#allocation2 + $0x10] sm:$0xff] }
  0x5e   : > { %v288_v24 = vld [vmem:[#allocation2 + $0x18] sm:$0xff] }
  0x5f   : > { %677 = vmatpush3.bf16.xpose.msra.mxu0 %v676_v16  ;;  %v679_v26 = vpack.c.bf16 %v288_v24, %v287_v23 }
  0x60   : > { %678 = vmatprep.subr.bf16.mxu0 %v960_v15 }
  0x67   : > { %680 = vmatpush3.bf16.xpose.msra.mxu0 %v679_v26 }
  0x6e   : > { %657 = vmatmul.mubr.f32.vlgmr.msra.gmra.mrb[0].mxu0 %v963_v27 }
 0x141   : > { %v355_v28 = vpop.f32.mrb[0].mxu0 }
 0x142   : > { %v658_v29 = vpop.f32.mrb[1].mxu0  ;;  %668 = vmatmul.mubr.msk.f32.vlgmr.msra.gmra.mrb[0].mxu1 %vm364_vm1, %v355_v28 }
 0x143   : > { %672 = vmatprep.mubr.msk.f32.mxu1 %vm961_vm0, %v962_v17  ;;  %671 = vmatpush3.msk.msra.mxu1 %vm445_vm2, %v439_v30 }
 0x215   : > { %v434_v32 = vpop.f32.mrb[0].mxu1 }
 0x216   : > { %v435_v33 = vadd.f32 %v434_v32, %v363_v31  ;;  %v669_v34 = vpop.f32.mrb[1].mxu1 }
 0x218   : > { %v438_v35 = vmax.f32 %v435_v33, 0.0 }
 0x21a   : > { %673 = vmatmul.mubr.msk.f32.vlgmr.msra.gmra.mrb[2].mxu1 %vm441_vm3, %v438_v35 }
 0x2ed   : > { %v515_v37 = vpop.f32.mrb[2].mxu1 }
 0x2ee   : > { %v516_v38 = vadd.f32 %v515_v37, %v440_v36  ;;  %v674_v39 = vpop.f32.mrb[3].mxu1 }
 0x2f0   : > { %v519_v40 = vsub.f32 0.0, %v516_v38 }
 0x2f2   : > { %v520_v41 = vmul.f32 1.442695, %v519_v40 }
 0x2f4   : > { %797 = vpow2.f32 %v520_v41 }
 0x2fe   : > { %v798_v42 = vpop.eup %797 }
 0x2ff   : > { %v522_v43 = vadd.f32 1.0, %v798_v42 }
 0x301   : > { %799 = vrcp.f32 %v522_v43 }
 0x30b   : > { %v800_v44 = vpop.eup %799 }
 0x30c   : > { %526 = vst.msk [vmem:[%s1148_s6] sm:$0x1] %vm525_vm4, %v800_v44 }
 0x30d PF: > { %s633_s30 = sshll.u32 %s941_s25, 4  ;;  %s1259_s9 = sld [smem:[#allocation12_spill]] }
 0x30e   : > { %s540_s13 = sshll.u32 %s1148_s6, 4  ;;  %s528_s14 = scalar_lea.sflag [#allocation5], %s255_s10  ;;  %s541_s13 = int_to_ptr.vmem [resolvable:$true] %s540_s13 }
 0x30f   : > { %s831_s29 = scalar_lea.vmem %s541_s13, 16  ;;  %p1260_p4 = scmp.ne.s32.totalorder %s1255_s15, 0 }
 0x310   : > { %p832_p2 = scmp.ne.s32.totalorder %s541_s13, %s831_s29  ;;  %s964_s11 = smov [#allocation6]  }
 0x311   : > { %s835_s5 = sshll.u32 %s964_s11, 4  ;;  %s836_s5 = int_to_ptr.vmem [resolvable:$false] %s835_s5 }
 0x312   : > { %p833_p0 = pnand %p832_p2, %p1260_p4  ;;  %s837_s12 = scalar_lea.vmem %s836_s5, 32 }
 0x313   : > { %s1181_s16 = scalar_lea.hbm %s1259_s9, %s633_s30  ;;  %p838_p5 = scmp.lt.s32.totalorder %s541_s13, %s836_s5 }
 0x314   : > { %p834_p1 = pneg %p833_p0  ;;  %p839_p8 = scmp.lt.s32.totalorder %s837_s12, %s831_s29 }
 0x316   : > { %p840_p3 = por %p839_p8, %p838_p5 }
 0x318   : > { %p841_p10 = pnand %p840_p3, %p834_p1 }
 0x31a   : > { %844 = shalt.err (!%p841_p10)
}
 0x31b   : > { %s845_s25 = scalar_lea.hbm %s1181_s16, 16  ;;  %s849_s8 = scalar_lea.hbm %s1259_s9, 32 }
 0x31c   : > { %p846_p11 = scmp.ne.s32.totalorder %s1181_s16, %s845_s25  ;;  %p850_p13 = scmp.lt.u32.totalorder %s1181_s16, %s1259_s9 }
 0x31d   : > { %p851_p12 = scmp.lt.u32.totalorder %s849_s8, %s845_s25  ;;  %p853_p2 = scmp.lt.u32.totalorder %s845_s25, %s1181_s16 }
 0x31e   : > { %p847_p6 = pnand %p846_p11, %p1260_p4 }
 0x31f   : > { %p852_p7 = por %p851_p12, %p850_p13 }
 0x320   : > { %p848_p9 = pneg %p847_p6 }
 0x321   : > { %p854_p0 = por %p853_p2, %p852_p7 }
 0x323   : > { %p855_p1 = pnand %p854_p0, %p848_p9 }
 0x325   : > { %858 = shalt.err (!%p855_p1)
}
 0x326   : > { %689 = dma.vmem_to_hbm [thread:$0]  (%p1260_p4), %s541_s13, 16, %s1181_s16, %s528_s14  }
 0x327 PF: > { %p700_p5 = scmp.ge.s32.totalorder %s953_s28, 2  ;;  %s552_s24 = sand.u32 1, %s913_s18  }
 0x328   : > { %p1261_p8 = scmp.ne.s32.totalorder %s1257_s21, 0  ;;  %s553_s29 = scalar_lea.sflag [#allocation5], %s552_s24 }
 0x32a   : > { %p696_p3 = pnand %p700_p5, %p1261_p8 }
 0x32c   : > { %908 = dma.done.wait (!%p696_p3), %s553_s29, 16  }
 0x32d   : > { %910 = vsyncadd (!%p696_p3), %s553_s29, 4294967280  ;;  %s21_s28 = sadd.s32 1, %s953_s28   ;;  %s1262_s11 = sld [smem:[#allocation11_spill]] }
 0x32e   : > { %p18_p10 = scmp.ge.s32.totalorder %s21_s28, 6   ;;  %s1263_s15 = sld [smem:[#allocation9_spill]] }
 0x32f   : > { %s1264_s16 = sld [smem:[#allocation10_spill]]  ;;  %s1265_s18 = smov %s917_s19 }
 0x330   : > { %s1266_s19 = smov %s921_s20  ;;  %s1268_s21 = smov %s929_s22 }
 0x331   : > { %s1269_s22 = smov %s933_s23  ;;  %s1270_s23 = smov %s1085_s17 }
 0x332   : > { %s1271_s24 = smov %s945_s26  ;;  %s1272_s25 = smov %s949_s27 }
 0x333   : > { %s1267_s20 = smov %s1262_s11  ;;  %20 = sbr.rel (!%p18_p10) target bundleno = 11 (0xb), region = 93 }
 0x334   : > { %s1273_s26 = smov %s1263_s15 }
 0x335   : > { %s1274_s27 = smov %s1264_s16 }
 0x33a   :  { %557 = vsyncpa [#allocation4], 1 }
 0x33b   :  { %559 = vsyncpa [#allocation4 + $0x1], 1 }
 0x33c   :  { %560 = vsyncpa [#allocation5], 1 }
 0x33d   :  { %562 = vsyncpa [#allocation5 + $0x1], 1 }

</bundles_post_ra>
